<compile_context>
chip_gen: v6e
topology: v6e:2x2x1
jax: 0.10.0
libtpu: 0.0.40
codegen_flags: <defaults>
</compile_context>

<pallas_src>
import jax
import jax.numpy as jnp
from jax import lax
from jax.experimental import pallas as pl
from jax.experimental.pallas import tpu as pltpu


def _frozen_bn_kernel(scale_ref, bias_ref, x_ref, o_ref):
    # scale/bias block is either (row_t, 1) (per-row) or (1, lane_t) (per-lane);
    # jnp broadcasting handles both against the (row_t, lane_t) data block.
    x = x_ref[...].astype(jnp.float32)
    o_ref[...] = (x * scale_ref[...] + bias_ref[...]).astype(o_ref.dtype)


def _vmem_limit_bytes():
    """Scoped-VMEM limit sized per generation (~64 MiB on 128 MiB chips,
    ~40 MiB on v7x's 64 MiB VMEM)."""
    try:
        cap = pltpu.get_tpu_info().vmem_capacity_bytes
    except Exception:
        cap = 64 * 1024 * 1024  # conservative fallback -> 40 MiB limit
    return min(64 * 1024 * 1024, (cap * 5) // 8)


def _choose_tiles(rows, cols, itemsize, budget):
    """Pick a (row, lane) block shape.

    Lane: prefer FULL row width (contiguous DMA, no masked edge lane block)
    whenever an 8-row full-width block fits the budget; otherwise a
    128-multiple cap.  Row: largest multiple of 8 within budget, or full
    extent.  Partial edge blocks are legal; full-extent dims are always legal.
    """
    if cols * itemsize * 8 <= budget:
        lane = cols  # full extent -> 1-D effective grid over rows
    else:
        lane = max(128, (budget // (8 * itemsize)) // 128 * 128)
        if cols % 128 == 0:
            lane = min(lane, cols)
    budget_rows = max(8, (budget // (itemsize * lane)) // 8 * 8)
    row = rows if rows <= budget_rows else budget_rows
    return row, lane


def frozen_batch_norm_2d(x, weight, bias, running_mean, running_var):
    """FrozenBatchNorm2d.forward for NCHW input x."""
    N, C, H, W = x.shape
    spatial = H * W

    # Fold the per-channel affine once, in float32 (output cast back to x.dtype
    # inside the kernel).
    w32 = weight.astype(jnp.float32)
    b32 = bias.astype(jnp.float32)
    m32 = running_mean.astype(jnp.float32)
    v32 = running_var.astype(jnp.float32)
    scale = w32 * lax.rsqrt(v32)
    bias_eff = b32 - m32 * scale

    if spatial >= 128:
        # Layout A: (N*C, H*W) with per-row params.  Row r = n*C + c -> channel c.
        rows, cols = N * C, spatial
        x2 = x.reshape(rows, cols)
        scale2 = jnp.tile(scale, N).reshape(rows, 1)
        bias2 = jnp.tile(bias_eff, N).reshape(rows, 1)
        per_lane_params = False
    else:
        # Layout B (small spatial): (N, C*H*W) with per-lane params so stores
        # stay lane-dense even when H*W < 128.
        rows, cols = N, C * spatial
        x2 = x.reshape(rows, cols)
        scale2 = jnp.repeat(scale, spatial).reshape(1, cols)
        bias2 = jnp.repeat(bias_eff, spatial).reshape(1, cols)
        per_lane_params = True

    vmem_limit = _vmem_limit_bytes()
    # ~2 double-buffered streams (x in, y out) of `budget` bytes each plus tiny
    # params must fit comfortably inside the scoped limit.
    budget = min(8 * 1024 * 1024, vmem_limit // 10)
    row_t, lane_t = _choose_tiles(rows, cols, x.dtype.itemsize, budget)
    grid = (pl.cdiv(rows, row_t), pl.cdiv(cols, lane_t))

    if per_lane_params:
        p_spec = pl.BlockSpec((1, lane_t), lambda i, j: (0, j))
    else:
        p_spec = pl.BlockSpec((row_t, 1), lambda i, j: (i, 0))
    x_spec = pl.BlockSpec((row_t, lane_t), lambda i, j: (i, j))

    out2 = pl.pallas_call(
        _frozen_bn_kernel,
        out_shape=jax.ShapeDtypeStruct((rows, cols), x.dtype),
        grid_spec=pl.GridSpec(
            grid=grid,
            in_specs=[p_spec, p_spec, x_spec],
            out_specs=x_spec,
        ),
        compiler_params=pltpu.CompilerParams(
            # Every (i, j) tile is independent; both axes parallel so v7x's two
            # TensorCores can split even single-row-block cases. No-op on v5e/v6e.
            dimension_semantics=("parallel", "parallel"),
            vmem_limit_bytes=vmem_limit,
        ),
    )(scale2, bias2, x2)

    return out2.reshape(N, C, H, W)


def _reference(x, weight, bias, running_mean, running_var):
    scale = weight * lax.rsqrt(running_var)
    bias_eff = bias - running_mean * scale
    return x * scale.reshape(1, -1, 1, 1) + bias_eff.reshape(1, -1, 1, 1)


if __name__ == "__main__":
    key = jax.random.PRNGKey(0)

    def make_case(key, N, C, H, W):
        kx, kw, kb, km, kv = jax.random.split(key, 5)
        x = jax.random.normal(kx, (N, C, H, W), dtype=jnp.float32)
        weight = 1.0 + 0.1 * jax.random.normal(kw, (C,), dtype=jnp.float32)
        bias = 0.1 * jax.random.normal(kb, (C,), dtype=jnp.float32)
        running_mean = 0.05 * jax.random.normal(km, (C,), dtype=jnp.float32)
        running_var = 1.0 + 0.1 * jax.random.uniform(kv, (C,), dtype=jnp.float32)
        return x, weight, bias, running_mean, running_var

    k1, k2 = jax.random.split(key)

    # Layout A path (H*W >= 128).
    case_a = make_case(k1, 2, 4, 16, 16)
    out_a = jax.block_until_ready(frozen_batch_norm_2d(*case_a))
    ref_a = _reference(*case_a)
    assert jnp.allclose(out_a, ref_a, atol=1e-5, rtol=1e-5), "mismatch (layout A)"

    # Layout B path (H*W < 128, small feature map).
    case_b = make_case(k2, 2, 8, 7, 7)
    out_b = jax.block_until_ready(frozen_batch_norm_2d(*case_b))
    ref_b = _reference(*case_b)
    assert jnp.allclose(out_b, ref_b, atol=1e-5, rtol=1e-5), "mismatch (layout B)"

    print("KERNEL_OK")
</pallas_src>

<mosaic_0001>
module attributes {stable_mosaic.version = 11 : i64} {
  func.func @_frozen_bn_kernel(%arg0: i32, %arg1: i32, %arg2: memref<8x1xf32, #tpu.memory_space<vmem>>, %arg3: memref<8x1xf32, #tpu.memory_space<vmem>>, %arg4: memref<8x256xf32, #tpu.memory_space<vmem>>, %arg5: memref<8x256xf32, #tpu.memory_space<vmem>>) attributes {dimension_semantics = [#tpu.dimension_semantics<parallel>, #tpu.dimension_semantics<parallel>], iteration_bounds = array<i64: 1, 1>, scalar_prefetch = 0 : i64, scratch_operands = 0 : i64, tpu.core_type = #tpu.core_type<tc>, window_params = [{transform_indices = @transform_0, window_bounds = array<i64: 8, 1>}, {transform_indices = @transform_1, window_bounds = array<i64: 8, 1>}, {transform_indices = @transform_2, window_bounds = array<i64: 8, 256>}, {transform_indices = @transform_3, window_bounds = array<i64: 8, 256>}]} {
    %c0 = arith.constant 0 : index
    %c0_0 = arith.constant 0 : index
    %0 = vector.load %arg4[%c0, %c0_0] : memref<8x256xf32, #tpu.memory_space<vmem>>, vector<8x256xf32>
    %c0_1 = arith.constant 0 : index
    %c0_2 = arith.constant 0 : index
    %1 = vector.load %arg2[%c0_1, %c0_2] : memref<8x1xf32, #tpu.memory_space<vmem>>, vector<8x1xf32>
    %2 = vector.broadcast %1 : vector<8x1xf32> to vector<8x256xf32>
    %3 = arith.mulf %0, %2 : vector<8x256xf32>
    %c0_3 = arith.constant 0 : index
    %c0_4 = arith.constant 0 : index
    %4 = vector.load %arg3[%c0_3, %c0_4] : memref<8x1xf32, #tpu.memory_space<vmem>>, vector<8x1xf32>
    %5 = vector.broadcast %4 : vector<8x1xf32> to vector<8x256xf32>
    %6 = arith.addf %3, %5 : vector<8x256xf32>
    %c0_5 = arith.constant 0 : index
    %c0_6 = arith.constant 0 : index
    %7 = vector.load %arg5[%c0_5, %c0_6] : memref<8x256xf32, #tpu.memory_space<vmem>>, vector<8x256xf32>
    tpu.vector_store %arg5[%c0_5, %c0_6], %6 {strides = array<i32>} : memref<8x256xf32, #tpu.memory_space<vmem>>, vector<8x256xf32>,
    return
  }
  func.func @transform_0(%arg0: i32, %arg1: i32) -> (i32, i32) {
    %c0_i32 = arith.constant 0 : i32
    %c0_i32_0 = arith.constant 0 : i32
    return %arg0, %c0_i32 : i32, i32
  }
  func.func @transform_1(%arg0: i32, %arg1: i32) -> (i32, i32) {
    %c0_i32 = arith.constant 0 : i32
    %c0_i32_0 = arith.constant 0 : i32
    return %arg0, %c0_i32 : i32, i32
  }
  func.func @transform_2(%arg0: i32, %arg1: i32) -> (i32, i32) {
    %c0_i32 = arith.constant 0 : i32
    return %arg0, %arg1 : i32, i32
  }
  func.func @transform_3(%arg0: i32, %arg1: i32) -> (i32, i32) {
    %c0_i32 = arith.constant 0 : i32
    return %arg0, %arg1 : i32, i32
  }
}

</mosaic_0001>

<bundles_post_ra>
// kernel: tpu_custom_call.1
= control target key start
LH: loop header
LB: loop body
LE: loop exit
PB: predicated region body
PF: predicated region fallthrough
CT: control target
= control target key end

     0   :  { %v74_v1 = vmov 0   ;;  %s111_s0 = inlined_call_operand.vmem [shape: f32[8,1], index: 0, kind: input, shape index: {}]   ;;  %s112_s1 = inlined_call_operand.vmem [shape: f32[8,1], index: 1, kind: input, shape index: {}]   ;;  %s113_s2 = inlined_call_operand.vmem [shape: f32[8,256], index: 2, kind: input, shape index: {}]   ;;  %s114_s3 = inlined_call_operand.hbm [shape: f32[8,256], index: 3, kind: output, shape index: {}]  }
   0x1   :  { %v17_v0 = vld [vmem:[%s111_s0] sm:$0xff]  ;;  %51 = vset.pattern.permute.xlu0 %v74_v1 }
   0x2   :  { %8 = vsyncpa [#allocation3], 0  ;;  %20 = vperm.xlu0 %51, %v17_v0   ;;  %v25_v2 = vld [vmem:[%s112_s1] sm:$0xff]  ;;  %v16_v5 = vld [vmem:[%s113_s2 + $0x8] sm:$0xff]  ;;  %s75_s20 = smov [#allocation2]  }
   0x3   :  { %v15_v4 = vld [vmem:[%s113_s2] sm:$0xff]  ;;  %s41_s0 = sshll.u32 %s75_s20, 4  ;;  %s42_s0 = int_to_ptr.vmem [resolvable:$true] %s41_s0 }
   0x4   :  { %s52_s1 = scalar_lea.vmem %s42_s0, 256  ;;  %p57_p1 = scmp.lt.s32.totalorder %s42_s0, %s42_s0 }
   0x5   :  { %p53_p0 = scmp.ne.s32.totalorder %s42_s0, %s52_s1  ;;  %p58_p2 = scmp.lt.s32.totalorder %s52_s1, %s52_s1 }
   0x6   :  { %28 = vperm.xlu0 %51, %v25_v2  }
   0x7   :  { %p59_p3 = por %p58_p2, %p57_p1 }
   0x9   :  { %p60_p4 = pnand %p59_p3, %p53_p0 }
  0x7d   :  { %v21_v3 = vpop.permute.xlu0 %20 }
  0x7e   :  { %v23_v6 = vmul.f32 %v21_v3, %v15_v4  ;;  %v24_v7 = vmul.f32 %v21_v3, %v16_v5 }
  0x81   :  { %v29_v8 = vpop.permute.xlu0 %28 }
  0x82   :  { %v31_v9 = vadd.f32 %v29_v8, %v23_v6  ;;  %v32_v10 = vadd.f32 %v29_v8, %v24_v7 }
  0x84   :  { %33 = vst [vmem:[#allocation2] sm:$0xff] %v31_v9  ;;  %34 = vst [vmem:[#allocation2 + $0x8] sm:$0xff] %v32_v10 }
  0x85   :  { %63 = shalt.err (!%p60_p4)
}
  0x86   :  { %44 = dma.vmem_to_hbm [thread:$0]  %s42_s0, 256, %s114_s3, [#allocation3]  }
  0x87   :  { %72 = dma.done.wait [#allocation3], 256  }
  0x88   :  { %73 = vsyncadd [#allocation3], 4294967040 }
  0x89   :  { %48 = vsyncpa [#allocation3], 1 }

</bundles_post_ra>
